<compile_context>
chip_gen: v7x
topology: tpu7x:2x2x1
jax: 0.10.0
libtpu: 0.0.40
codegen_flags: <defaults>
</compile_context>

<pallas_src>
import functools

import jax
import jax.numpy as jnp
from jax import lax
from jax.experimental import pallas as pl
from jax.experimental.pallas import tpu as pltpu


def _round_up(x: int, m: int) -> int:
    return -(-x // m) * m


def _linear_kernel(x_ref, w_ref, b_ref, o_ref, acc_ref):
    """One (tm, tn) output tile; grid axis 2 reduces over K.

    x_ref:  (tm, tk)  activations
    w_ref:  (tn, tk)  weight in native PyTorch (out, in) layout
    b_ref:  (1,  tn)  bias
    o_ref:  (tm, tn)  output tile
    acc_ref:(tm, tn)  f32 accumulator (VMEM scratch, persists across k steps)
    """
    k = pl.program_id(2)

    # Contract last dims of both operands so the weight is consumed as-is
    # (no transpose anywhere); MXU handles this natively.
    partial = lax.dot_general(
        x_ref[...], w_ref[...],
        dimension_numbers=(((1,), (1,)), ((), ())),
        preferred_element_type=jnp.float32,
    )

    @pl.when(k == 0)
    def _():
        acc_ref[...] = partial          # first K step: write, no zero-fill

    @pl.when(k != 0)
    def _():
        acc_ref[...] += partial

    @pl.when(k == pl.num_programs(2) - 1)
    def _():
        # bias broadcast over rows, added once at the end of the K reduction
        o_ref[...] = (acc_ref[...] + b_ref[...]).astype(o_ref.dtype)


def _tile_targets():
    """Generation-aware default (tm, tn, tk) targets.

    Footprints (f32, double-buffered in/out + f32 acc):
      v5e  (256, 512, 512)   ~4.5 MiB  (fits 16 MiB default scoped VMEM)
      v6e/v7x (512,1024,1024) ~18 MiB  (fits 32 MiB default scoped VMEM)
    """
    try:
        kind = jax.devices()[0].device_kind.lower()
    except Exception:
        kind = ""
    if "v5 lite" in kind or "v5e" in kind or "v5lite" in kind:
        return 256, 512, 512
    return 512, 1024, 1024


@functools.partial(jax.jit, static_argnames=("tm", "tn", "tk"))
def column_parallel_linear(x, weight, bias=None, *, tm=None, tn=None, tk=None):
    """Y = x @ weight.T + bias   (weight: (out, in), bias: (out,) or None)."""
    orig_lead = x.shape[:-1]
    N, K = weight.shape
    assert x.shape[-1] == K, "input feature dim must match weight in_features"

    if bias is None:
        bias = jnp.zeros((N,), dtype=x.dtype)

    x2d = x.reshape(-1, K)
    M = x2d.shape[0]

    # Tile selection: generation-aware targets, clamped to the aligned problem
    # size so small problems collapse to single, correctly-aligned tiles.
    tm_t, tn_t, tk_t = _tile_targets()
    tm = tm or min(tm_t, _round_up(M, 8))      # sublane-aligned
    tn = tn or min(tn_t, _round_up(N, 128))    # lane-dense output stores
    tk = tk or min(tk_t, _round_up(K, 128))

    # Pad to tile multiples (zero padding is exact for the matmul; trimmed after).
    Mp, Np, Kp = _round_up(M, tm), _round_up(N, tn), _round_up(K, tk)
    if (Mp, Kp) != (M, K):
        x2d = jnp.pad(x2d, ((0, Mp - M), (0, Kp - K)))
    w = weight
    if (Np, Kp) != (N, K):
        w = jnp.pad(w, ((0, Np - N), (0, Kp - K)))
    b2d = bias.reshape(1, N)
    if Np != N:
        b2d = jnp.pad(b2d, ((0, 0), (0, Np - N)))

    grid = (Mp // tm, Np // tn, Kp // tk)
    itemsize = jnp.dtype(x.dtype).itemsize

    out2d = pl.pallas_call(
        _linear_kernel,
        out_shape=jax.ShapeDtypeStruct((Mp, Np), x.dtype),
        grid_spec=pltpu.PrefetchScalarGridSpec(
            num_scalar_prefetch=0,
            grid=grid,
            in_specs=[
                pl.BlockSpec((tm, tk), lambda i, j, k: (i, k)),   # x tile
                pl.BlockSpec((tn, tk), lambda i, j, k: (j, k)),   # W (out,in) tile
                pl.BlockSpec((1, tn), lambda i, j, k: (0, j)),    # bias tile
            ],
            out_specs=pl.BlockSpec((tm, tn), lambda i, j, k: (i, j)),
            scratch_shapes=[pltpu.VMEM((tm, tn), jnp.float32)],
        ),
        compiler_params=pltpu.CompilerParams(
            dimension_semantics=("parallel", "parallel", "arbitrary")
        ),
        cost_estimate=pl.CostEstimate(
            flops=2 * Mp * Np * Kp,
            transcendentals=0,
            bytes_accessed=(Mp * Kp + Np * Kp + Mp * Np + Np) * itemsize,
        ),
    )(x2d, w, b2d)

    out2d = out2d[:M, :N]
    return out2d.reshape(*orig_lead, N)


def init_column_parallel_linear_params(key, in_features, out_features,
                                        world_size=1, dtype=jnp.float32):
    """xavier_normal_ weight (out_per_partition, in), zero bias."""
    assert out_features % world_size == 0
    out_per_partition = out_features // world_size
    std = (2.0 / (in_features + out_per_partition)) ** 0.5  # xavier normal, gain=1
    weight = std * jax.random.normal(
        key, (out_per_partition, in_features), dtype=dtype
    )
    bias = jnp.zeros((out_per_partition,), dtype=dtype)
    return weight, bias


if __name__ == "__main__":
    key = jax.random.PRNGKey(0)
    k_x, k_w = jax.random.split(key)

    batch, seq, in_features, out_features = 2, 8, 32, 64

    x = jax.random.normal(k_x, (batch, seq, in_features), dtype=jnp.float32)
    weight, bias = init_column_parallel_linear_params(
        k_w, in_features, out_features, world_size=1
    )

    # TODO(synk): copy_to/gather_from_model_parallel_region are identities for
    # world_size == 1; multi-chip all-gather would use make_async_remote_copy.
    y = column_parallel_linear(x, weight, bias)
    y = jax.block_until_ready(y)

    # reference check (plain JAX)
    y_ref = x @ weight.T + bias
    assert y.shape == (batch, seq, out_features)
    assert jnp.allclose(y, y_ref, atol=1e-5, rtol=1e-5)

    print("KERNEL_OK")
</pallas_src>

<mosaic_0001>
module attributes {stable_mosaic.version = 11 : i64} {
  func.func @_linear_kernel(%arg0: i32, %arg1: i32, %arg2: i32, %arg3: memref<16x128xf32, #tpu.memory_space<vmem>>, %arg4: memref<128x128xf32, #tpu.memory_space<vmem>>, %arg5: memref<1x128xf32, #tpu.memory_space<vmem>>, %arg6: memref<16x128xf32, #tpu.memory_space<vmem>>, %arg7: memref<16x128xf32, #tpu.memory_space<vmem>>) attributes {dimension_semantics = [#tpu.dimension_semantics<parallel>, #tpu.dimension_semantics<parallel>, #tpu.dimension_semantics<arbitrary>], iteration_bounds = array<i64: 1, 1, 1>, scalar_prefetch = 0 : i64, scratch_operands = 1 : i64, tpu.core_type = #tpu.core_type<tc>, window_params = [{transform_indices = @transform_0, window_bounds = array<i64: 16, 128>}, {transform_indices = @transform_1, window_bounds = array<i64: 128, 128>}, {transform_indices = @transform_2, window_bounds = array<i64: 1, 128>}, {transform_indices = @transform_3, window_bounds = array<i64: 16, 128>}]} {
    %c0 = arith.constant 0 : index
    %c0_0 = arith.constant 0 : index
    %0 = vector.load %arg3[%c0, %c0_0] : memref<16x128xf32, #tpu.memory_space<vmem>>, vector<16x128xf32>
    %c0_1 = arith.constant 0 : index
    %c0_2 = arith.constant 0 : index
    %1 = vector.load %arg4[%c0_1, %c0_2] : memref<128x128xf32, #tpu.memory_space<vmem>>, vector<128x128xf32>
    %cst = arith.constant dense<0.000000e+00> : vector<16x128xf32>
    %2 = tpu.matmul %0, %1, %cst {dimension_numbers = #tpu.dot_dimension_numbers<[1], [1], [0], [0], [0, 0, 1, 0], [], []>} : vector<16x128xf32>, vector<128x128xf32>, vector<16x128xf32> -> vector<16x128xf32>
    %c0_i32 = arith.constant 0 : i32
    %3 = arith.cmpi eq, %arg2, %c0_i32 : i32
    %4 = arith.extui %3 : i1 to i32
    %c0_i32_3 = arith.constant 0 : i32
    %5 = arith.cmpi ne, %4, %c0_i32_3 : i32
    scf.if %5 {
      %c0_8 = arith.constant 0 : index
      %c0_9 = arith.constant 0 : index
      %12 = vector.load %arg7[%c0_8, %c0_9] : memref<16x128xf32, #tpu.memory_space<vmem>>, vector<16x128xf32>
      tpu.vector_store %arg7[%c0_8, %c0_9], %2 {strides = array<i32>} : memref<16x128xf32, #tpu.memory_space<vmem>>, vector<16x128xf32>,
    } else {
    }
    %c0_i32_4 = arith.constant 0 : i32
    %6 = arith.cmpi ne, %arg2, %c0_i32_4 : i32
    %7 = arith.extui %6 : i1 to i32
    %c0_i32_5 = arith.constant 0 : i32
    %8 = arith.cmpi ne, %7, %c0_i32_5 : i32
    scf.if %8 {
      %c0_8 = arith.constant 0 : index
      %c0_9 = arith.constant 0 : index
      %12 = vector.load %arg7[%c0_8, %c0_9] : memref<16x128xf32, #tpu.memory_space<vmem>>, vector<16x128xf32>
      %13 = arith.addf %12, %2 : vector<16x128xf32>
      %c0_10 = arith.constant 0 : index
      %c0_11 = arith.constant 0 : index
      %14 = vector.load %arg7[%c0_10, %c0_11] : memref<16x128xf32, #tpu.memory_space<vmem>>, vector<16x128xf32>
      tpu.vector_store %arg7[%c0_10, %c0_11], %13 {strides = array<i32>} : memref<16x128xf32, #tpu.memory_space<vmem>>, vector<16x128xf32>,
    } else {
    }
    %c0_i32_6 = arith.constant 0 : i32
    %9 = arith.cmpi eq, %arg2, %c0_i32_6 : i32
    %10 = arith.extui %9 : i1 to i32
    %c0_i32_7 = arith.constant 0 : i32
    %11 = arith.cmpi ne, %10, %c0_i32_7 : i32
    scf.if %11 {
      %c0_8 = arith.constant 0 : index
      %c0_9 = arith.constant 0 : index
      %12 = vector.load %arg7[%c0_8, %c0_9] : memref<16x128xf32, #tpu.memory_space<vmem>>, vector<16x128xf32>
      %c0_10 = arith.constant 0 : index
      %c0_11 = arith.constant 0 : index
      %13 = vector.load %arg5[%c0_10, %c0_11] : memref<1x128xf32, #tpu.memory_space<vmem>>, vector<1x128xf32>
      %14 = vector.broadcast %13 : vector<1x128xf32> to vector<16x128xf32>
      %15 = arith.addf %12, %14 : vector<16x128xf32>
      %c0_12 = arith.constant 0 : index
      %c0_13 = arith.constant 0 : index
      %16 = vector.load %arg6[%c0_12, %c0_13] : memref<16x128xf32, #tpu.memory_space<vmem>>, vector<16x128xf32>
      tpu.vector_store %arg6[%c0_12, %c0_13], %15 {strides = array<i32>} : memref<16x128xf32, #tpu.memory_space<vmem>>, vector<16x128xf32>,
    } else {
    }
    return
  }
  func.func @transform_0(%arg0: i32, %arg1: i32, %arg2: i32) -> (i32, i32) {
    %c0_i32 = arith.constant 0 : i32
    return %arg0, %arg2 : i32, i32
  }
  func.func @transform_1(%arg0: i32, %arg1: i32, %arg2: i32) -> (i32, i32) {
    %c0_i32 = arith.constant 0 : i32
    return %arg1, %arg2 : i32, i32
  }
  func.func @transform_2(%arg0: i32, %arg1: i32, %arg2: i32) -> (i32, i32) {
    %c0_i32 = arith.constant 0 : i32
    %c0_i32_0 = arith.constant 0 : i32
    return %c0_i32, %arg1 : i32, i32
  }
  func.func @transform_3(%arg0: i32, %arg1: i32, %arg2: i32) -> (i32, i32) {
    %c0_i32 = arith.constant 0 : i32
    return %arg0, %arg1 : i32, i32
  }
}

</mosaic_0001>

<bundles_post_ra>
// kernel: column_parallel_linear.1
= control target key start
LH: loop header
LB: loop body
LE: loop exit
PB: predicated region body
PF: predicated region fallthrough
CT: control target
= control target key end

     0   :  { %s312_s1 = inlined_call_operand.vmem [shape: f32[128,128], index: 1, kind: input, shape index: {}]   ;;  %s313_s0 = inlined_call_operand.vmem [shape: f32[16,128], index: 0, kind: input, shape index: {}]   ;;  %s314_s2 = inlined_call_operand.vmem [shape: f32[1,128], index: 2, kind: input, shape index: {}]   ;;  %s315_s3 = inlined_call_operand.vmem [shape: f32[16,128], index: 3, kind: output, shape index: {}]  }
   0x1   :  { %v16_v0 = vld [vmem:[%s312_s1] sm:$0xff]  ;;  %v17_v1 = vld [vmem:[%s312_s1 + $0x8] sm:$0xff]  ;;  %v18_v2 = vld [vmem:[%s312_s1 + $0x10] sm:$0xff] }
   0x2   :  { %v197_v3 = vpack.c.bf16 %v17_v1, %v16_v0  ;;  %v19_v4 = vld [vmem:[%s312_s1 + $0x18] sm:$0xff]  ;;  %v14_v6 = vld [vmem:[%s313_s0] sm:$0xff]  ;;  %v21_v8 = vld [vmem:[%s312_s1 + $0x28] sm:$0xff] }
   0x3   :  { %v201_v5 = vpack.c.bf16 %v19_v4, %v18_v2  ;;  %v20_v7 = vld [vmem:[%s312_s1 + $0x20] sm:$0xff]  ;;  %194 = vmatprep.mubr.f32.mxu0 %v14_v6  ;;  %v22_v10 = vld [vmem:[%s312_s1 + $0x30] sm:$0xff]  ;;  %v23_v11 = vld [vmem:[%s312_s1 + $0x38] sm:$0xff] }
   0x4   :  { %198 = vmatprep.subr.bf16.mxu0 %v197_v3  ;;  %v205_v9 = vpack.c.bf16 %v21_v8, %v20_v7  ;;  %v209_v12 = vpack.c.bf16 %v23_v11, %v22_v10  ;;  %v24_v13 = vld [vmem:[%s312_s1 + $0x40] sm:$0xff]  ;;  %v25_v14 = vld [vmem:[%s312_s1 + $0x48] sm:$0xff]  ;;  %v26_v16 = vld [vmem:[%s312_s1 + $0x50] sm:$0xff] }
   0x5   :  { %200 = vmatpush3.bf16.xpose.msra.mxu0 %v197_v3  ;;  %v213_v15 = vpack.c.bf16 %v25_v14, %v24_v13  ;;  %v27_v17 = vld [vmem:[%s312_s1 + $0x58] sm:$0xff]  ;;  %v28_v19 = vld [vmem:[%s312_s1 + $0x60] sm:$0xff]  ;;  %v29_v20 = vld [vmem:[%s312_s1 + $0x68] sm:$0xff] }
   0x6   :  { %202 = vmatprep.subr.bf16.mxu0 %v201_v5  ;;  %v217_v18 = vpack.c.bf16 %v27_v17, %v26_v16  ;;  %v221_v21 = vpack.c.bf16 %v29_v20, %v28_v19  ;;  %v30_v22 = vld [vmem:[%s312_s1 + $0x70] sm:$0xff]  ;;  %v31_v23 = vld [vmem:[%s312_s1 + $0x78] sm:$0xff]  ;;  %v15_v25 = vld [vmem:[%s313_s0 + $0x8] sm:$0xff] }
   0x7   :  { %v225_v24 = vpack.c.bf16 %v31_v23, %v30_v22  ;;  %v143_v26 = vld [vmem:[%s314_s2] ss:$0 sm:$0xff] }
   0xd   :  { %204 = vmatpush3.bf16.xpose.msra.mxu0 %v201_v5 }
   0xe   :  { %206 = vmatprep.subr.bf16.mxu0 %v205_v9 }
  0x15   :  { %208 = vmatpush3.bf16.xpose.msra.mxu0 %v205_v9 }
  0x16   :  { %210 = vmatprep.subr.bf16.mxu0 %v209_v12 }
  0x1d   :  { %212 = vmatpush3.bf16.xpose.msra.mxu0 %v209_v12 }
  0x1e   :  { %214 = vmatprep.subr.bf16.mxu0 %v213_v15 }
  0x25   :  { %216 = vmatpush3.bf16.xpose.msra.mxu0 %v213_v15 }
  0x26   :  { %218 = vmatprep.subr.bf16.mxu0 %v217_v18 }
  0x2d   :  { %220 = vmatpush3.bf16.xpose.msra.mxu0 %v217_v18 }
  0x2e   :  { %222 = vmatprep.subr.bf16.mxu0 %v221_v21 }
  0x35   :  { %224 = vmatpush3.bf16.xpose.msra.mxu0 %v221_v21 }
  0x36   :  { %226 = vmatprep.subr.bf16.mxu0 %v225_v24 }
  0x3d   :  { %228 = vmatpush3.bf16.xpose.msra.mxu0 %v225_v24 }
  0x44   :  { %195 = vmatmul.mubr.f32.vlgmr.msra.gmra.mrb[0].mxu0 %v15_v25 }
 0x117   :  { %v196_v27 = vpop.f32.mrb[0].mxu0 }
 0x118   :  { %v136_v28 = vadd.f32 %v196_v27, %v143_v26  ;;  %v98_v29 = vpop.f32.mrb[1].mxu0 }
 0x119   :  { %v135_v30 = vadd.f32 %v143_v26, %v98_v29 }
 0x11a   :  { %138 = vst [vmem:[%s315_s3 + $0x8] sm:$0xff] %v136_v28 }
 0x11b   :  { %137 = vst [vmem:[%s315_s3] sm:$0xff] %v135_v30 }

</bundles_post_ra>
